<compile_context>
chip_gen: v5e
topology: v5e:2x2
jax: 0.10.0
libtpu: 0.0.40
codegen_flags: <defaults>
</compile_context>

<pallas_src>
import functools

import jax
import jax.numpy as jnp
from jax import lax
from jax.experimental import pallas as pl
from jax.experimental.pallas import tpu as pltpu


def _layer_norm(x, gamma, beta, eps=1e-5):
    # PyTorch nn.LayerNorm: biased variance over the last axis (f32 math).
    mean = jnp.mean(x, axis=-1, keepdims=True)
    var = jnp.mean((x - mean) ** 2, axis=-1, keepdims=True)
    return (x - mean) * lax.rsqrt(var + eps) * gamma + beta


def clip_layer_kernel(n_head, block_b,
                      x_ref,
                      ln1_g_ref, ln1_b_ref,
                      wqkv_ref, bqkv_ref,
                      wo_ref, bo_ref,
                      ln2_g_ref, ln2_b_ref,
                      w1_ref, b1_ref, w2_ref, b2_ref,
                      o_ref):
    S, E = x_ref.shape[1], x_ref.shape[2]
    H = n_head
    dh = E // H
    bf16 = jnp.bfloat16
    f32 = jnp.float32

    # Causal mask, shared across batch elements and heads (strict upper tri).
    row = lax.broadcasted_iota(jnp.int32, (S, S), 0)
    col = lax.broadcasted_iota(jnp.int32, (S, S), 1)
    causal = col > row

    # Grid-invariant parameters, loaded once per grid step.
    ln1_g, ln1_b = ln1_g_ref[...], ln1_b_ref[...]
    ln2_g, ln2_b = ln2_g_ref[...], ln2_b_ref[...]
    wqkv, bqkv = wqkv_ref[...], bqkv_ref[...]
    bo = bo_ref[...]
    w1, b1 = w1_ref[...], b1_ref[...]
    w2, b2 = w2_ref[...], b2_ref[...]

    for b in range(block_b):
        x = x_ref[b]                                   # (S, E) f32
        residue = x

        # ---- LayerNorm 1 (f32) ----
        h = _layer_norm(x, ln1_g, ln1_b)

        # ---- Fused, lane-dense QKV projection: one (S,E)@(E,3E) matmul ----
        # 1/sqrt(d_head) is folded into the Q weight/bias columns host-side.
        qkv = jnp.dot(h.astype(bf16), wqkv,
                      preferred_element_type=f32) + bqkv        # (S, 3E) f32

        # ---- Per-head causal attention; out-proj fused into the head sum ----
        attn = jnp.zeros((S, E), f32)
        for hd in range(H):
            lo = hd * dh
            q_h = qkv[:, lo:lo + dh].astype(bf16)               # (S, dh)
            k_h = qkv[:, E + lo:E + lo + dh].astype(bf16)       # (S, dh)
            v_h = qkv[:, 2 * E + lo:2 * E + lo + dh].astype(bf16)

            s = jnp.einsum("qd,kd->qk", q_h, k_h,
                           preferred_element_type=f32)          # (S, S) f32
            s = jnp.where(causal, -jnp.inf, s)
            s = s - jnp.max(s, axis=-1, keepdims=True)
            p = jnp.exp(s)
            p = p * pl.reciprocal(jnp.sum(p, axis=-1, keepdims=True),
                                  approx=True)

            o_h = jnp.dot(p.astype(bf16), v_h,
                          preferred_element_type=f32)           # (S, dh)
            # Fused head-merge + output projection: accumulate lane-dense
            # (S,dh)@(dh,E) partials — no (H,S,E) temporary.
            attn = attn + jnp.dot(o_h.astype(bf16), wo_ref[hd],
                                  preferred_element_type=f32)

        x = attn + bo + residue
        residue = x

        # ---- LayerNorm 2 + QuickGELU MLP (lane-dense matmuls) ----
        h = _layer_norm(x, ln2_g, ln2_b)
        h = jnp.dot(h.astype(bf16), w1,
                    preferred_element_type=f32) + b1            # (S, 4E) f32
        h = h * jax.nn.sigmoid(1.702 * h)                       # QuickGELU, f32
        h = jnp.dot(h.astype(bf16), w2,
                    preferred_element_type=f32) + b2            # (S, E) f32

        o_ref[b] = h + residue


_PARAM_ORDER = ["ln1_g", "ln1_b",
                "wqkv", "bqkv",
                "wo", "bo",
                "ln2_g", "ln2_b",
                "w1", "b1", "w2", "b2"]


def _pick_block_b(B, S, E):
    """Batch elements per grid step: amortize grid overhead for small configs,
    but keep >=2 grid steps when possible so the batch axis can shard across
    TensorCores (v7x megacore)."""
    if S * E <= 128 * 1024:
        target = 8
    elif S * E <= 512 * 1024:
        target = 4
    else:
        target = 1
    bb = 1
    for cand in range(1, min(B, target) + 1):
        if B % cand == 0:
            bb = cand
    if bb == B and B > 1:
        for cand in range(bb - 1, 0, -1):
            if B % cand == 0 and B // cand >= 2:
                bb = cand
                break
    return bb


def _pick_vmem_limit(plist, block_b, S, E, H):
    """VMEM budget from the actual resident set: single-buffered weights,
    double-buffered activation blocks, and the in-kernel f32/bf16 temporaries."""
    dh = E // H
    param_bytes = sum(int(p.size) * p.dtype.itemsize for p in plist)
    io_bytes = 2 * 2 * block_b * S * E * 4          # x + out blocks, double-buffered
    tmp_bytes = (
        S * 3 * E * (4 + 2)        # fused QKV activations (f32 + bf16 cast)
        + 3 * S * E * 4            # residual / normed / out-proj accumulator
        + 4 * S * S * 4            # scores, probs, mask iotas
        + 3 * S * dh * 4           # per-head q/k/v slices + AV partial
        + S * 4 * E * (4 + 2)      # MLP hidden (f32 + bf16 cast)
        + 2 * S * E * 2            # bf16 casts of LN outputs
    )
    want = param_bytes + io_bytes + tmp_bytes + (4 << 20)   # compiler scratch slack
    try:
        cap = pltpu.get_tpu_info().vmem_capacity_bytes
    except Exception:
        cap = 64 << 20             # conservative: v7x per-TensorCore VMEM
    # TODO(synk): if `want` exceeds the per-core cap (very large E), tile the
    # MLP over the 4E hidden axis instead of keeping w1/w2 fully resident.
    return int(max(min(want, (cap * 7) // 8), 16 << 20))


def clip_layer(x, kparams, n_head, block_b=None):
    B, S, E = x.shape
    if block_b is None:
        block_b = _pick_block_b(B, S, E)
    assert B % block_b == 0, "block_b must divide the batch size"
    plist = [kparams[n] for n in _PARAM_ORDER]
    vmem_limit = _pick_vmem_limit(plist, block_b, S, E, n_head)

    def param_spec(p):
        zero = (0,) * p.ndim
        # Grid-invariant weights: single-buffered (no double-buffer in VMEM).
        return pl.BlockSpec(p.shape, lambda b, _z=zero: _z,
                            pipeline_mode=pl.Buffered(1))

    x_spec = pl.BlockSpec((block_b, S, E), lambda b: (b, 0, 0))
    out_spec = pl.BlockSpec((block_b, S, E), lambda b: (b, 0, 0))

    return pl.pallas_call(
        functools.partial(clip_layer_kernel, n_head, block_b),
        out_shape=jax.ShapeDtypeStruct((B, S, E), jnp.float32),
        grid=(B // block_b,),
        in_specs=[x_spec] + [param_spec(p) for p in plist],
        out_specs=out_spec,
        compiler_params=pltpu.CompilerParams(
            dimension_semantics=("parallel",),
            vmem_limit_bytes=vmem_limit),
    )(x, *plist)


def make_torch_params(key, n_embed):
    """Deterministic synthetic parameters in PyTorch layout (out_feat, in_feat)."""
    E = n_embed
    ks = jax.random.split(key, 12)
    return {
        "in_proj_w": jax.random.normal(ks[0], (3 * E, E), jnp.float32) * 0.02,
        "in_proj_b": jax.random.normal(ks[1], (3 * E,), jnp.float32) * 0.02,
        "out_proj_w": jax.random.normal(ks[2], (E, E), jnp.float32) * 0.02,
        "out_proj_b": jax.random.normal(ks[3], (E,), jnp.float32) * 0.02,
        "lin1_w": jax.random.normal(ks[4], (4 * E, E), jnp.float32) * 0.02,
        "lin1_b": jax.random.normal(ks[5], (4 * E,), jnp.float32) * 0.02,
        "lin2_w": jax.random.normal(ks[6], (E, 4 * E), jnp.float32) * 0.02,
        "lin2_b": jax.random.normal(ks[7], (E,), jnp.float32) * 0.02,
        "ln1_g": 1.0 + 0.01 * jax.random.normal(ks[8], (E,), jnp.float32),
        "ln1_b": 0.01 * jax.random.normal(ks[9], (E,), jnp.float32),
        "ln2_g": 1.0 + 0.01 * jax.random.normal(ks[10], (E,), jnp.float32),
        "ln2_b": 0.01 * jax.random.normal(ks[11], (E,), jnp.float32),
    }


def pack_params(tp, n_head):
    """Repack PyTorch-layout params for the kernel:
       - fused lane-dense QKV weight (E, 3E) bf16, 1/sqrt(dh) folded into Q,
       - per-head output-projection weight (H, dh, E) bf16,
       - MLP weights transposed to (in, out) bf16; biases/LN params stay f32."""
    E = tp["ln1_g"].shape[0]
    H = n_head
    dh = E // H
    scale = 1.0 / jnp.sqrt(jnp.float32(dh))
    bf16 = jnp.bfloat16

    in_w, in_b = tp["in_proj_w"], tp["in_proj_b"]     # (3E, E), (3E,)
    wq = in_w[0 * E:1 * E] * scale                    # fold 1/sqrt(dh) into Q
    wk = in_w[1 * E:2 * E]
    wv = in_w[2 * E:3 * E]
    bq = in_b[0 * E:1 * E] * scale
    bk = in_b[1 * E:2 * E]
    bv = in_b[2 * E:3 * E]
    wqkv = jnp.concatenate([wq, wk, wv], axis=0).T    # (E, 3E): [Q | K | V] cols
    bqkv = jnp.concatenate([bq, bk, bv]).reshape(1, 3 * E)
    wo = tp["out_proj_w"].T.reshape(H, dh, E)         # wo[h,d,eo] = W[eo, h*dh+d]

    return {
        "ln1_g": tp["ln1_g"].reshape(1, E), "ln1_b": tp["ln1_b"].reshape(1, E),
        "wqkv": wqkv.astype(bf16), "bqkv": bqkv,
        "wo": wo.astype(bf16), "bo": tp["out_proj_b"].reshape(1, E),
        "ln2_g": tp["ln2_g"].reshape(1, E), "ln2_b": tp["ln2_b"].reshape(1, E),
        "w1": tp["lin1_w"].T.astype(bf16), "b1": tp["lin1_b"].reshape(1, 4 * E),
        "w2": tp["lin2_w"].T.astype(bf16), "b2": tp["lin2_b"].reshape(1, E),
    }


def reference_clip_layer(x, tp, n_head):
    """Pure-JAX f32 replica of the PyTorch forward (correctness oracle)."""
    B, S, E = x.shape
    dh = E // n_head

    def ln(z, g, b):
        m = z.mean(-1, keepdims=True)
        v = ((z - m) ** 2).mean(-1, keepdims=True)
        return (z - m) / jnp.sqrt(v + 1e-5) * g + b

    res = x
    h = ln(x, tp["ln1_g"], tp["ln1_b"])
    qkv = h @ tp["in_proj_w"].T + tp["in_proj_b"]
    q, k, v = jnp.split(qkv, 3, axis=-1)
    q = q.reshape(B, S, n_head, dh).transpose(0, 2, 1, 3)
    k = k.reshape(B, S, n_head, dh).transpose(0, 2, 1, 3)
    v = v.reshape(B, S, n_head, dh).transpose(0, 2, 1, 3)
    w = jnp.einsum("bhqd,bhkd->bhqk", q, k)
    mask = jnp.triu(jnp.ones((S, S), bool), 1)
    w = jnp.where(mask, -jnp.inf, w) / jnp.sqrt(jnp.float32(dh))
    w = jax.nn.softmax(w, axis=-1)
    o = jnp.einsum("bhqk,bhkd->bhqd", w, v)
    o = o.transpose(0, 2, 1, 3).reshape(B, S, E)
    o = o @ tp["out_proj_w"].T + tp["out_proj_b"]
    x = o + res
    res = x
    h = ln(x, tp["ln2_g"], tp["ln2_b"])
    h = h @ tp["lin1_w"].T + tp["lin1_b"]
    h = h * jax.nn.sigmoid(1.702 * h)
    h = h @ tp["lin2_w"].T + tp["lin2_b"]
    return h + res


if __name__ == "__main__":
    B, S, E, H = 2, 8, 32, 4   # batch, seq, n_embed, n_head
    key = jax.random.PRNGKey(0)
    kx, kp = jax.random.split(key)
    x = jax.random.normal(kx, (B, S, E), jnp.float32)

    torch_params = make_torch_params(kp, E)
    kparams = pack_params(torch_params, H)

    out = clip_layer(x, kparams, H)
    out = jax.block_until_ready(out)

    ref = reference_clip_layer(x, torch_params, H)
    assert out.shape == (B, S, E)
    max_err = jnp.max(jnp.abs(out - ref))
    # bf16 matmul operands + approx reciprocal -> relaxed (but still
    # bug-catching) tolerance vs. the pure-f32 reference.
    assert jnp.allclose(out, ref, atol=1e-2, rtol=1e-2), (
        f"max abs err = {max_err}")
    print("KERNEL_OK")
</pallas_src>

<mosaic_0001>
module attributes {stable_mosaic.version = 11 : i64} {
  func.func @clip_layer_kernel(%arg0: i32, %arg1: memref<1x8x32xf32, #tpu.memory_space<vmem>>, %arg2: memref<1x32xf32, #tpu.memory_space<vmem>>, %arg3: memref<1x32xf32, #tpu.memory_space<vmem>>, %arg4: memref<32x96xbf16, #tpu.memory_space<vmem>>, %arg5: memref<1x96xf32, #tpu.memory_space<vmem>>, %arg6: memref<4x8x32xbf16, #tpu.memory_space<vmem>>, %arg7: memref<1x32xf32, #tpu.memory_space<vmem>>, %arg8: memref<1x32xf32, #tpu.memory_space<vmem>>, %arg9: memref<1x32xf32, #tpu.memory_space<vmem>>, %arg10: memref<32x128xbf16, #tpu.memory_space<vmem>>, %arg11: memref<1x128xf32, #tpu.memory_space<vmem>>, %arg12: memref<128x32xbf16, #tpu.memory_space<vmem>>, %arg13: memref<1x32xf32, #tpu.memory_space<vmem>>, %arg14: memref<1x8x32xf32, #tpu.memory_space<vmem>>) attributes {dimension_semantics = [#tpu.dimension_semantics<parallel>], iteration_bounds = array<i64: 2>, scalar_prefetch = 0 : i64, scratch_operands = 0 : i64, tpu.core_type = #tpu.core_type<tc>, window_params = [{transform_indices = @transform_0, window_bounds = array<i64: 1, 8, 32>}, {pipeline_mode = #tpu.pipeline_mode<synchronous>, transform_indices = @transform_1, window_bounds = array<i64: 1, 32>}, {pipeline_mode = #tpu.pipeline_mode<synchronous>, transform_indices = @transform_2, window_bounds = array<i64: 1, 32>}, {pipeline_mode = #tpu.pipeline_mode<synchronous>, transform_indices = @transform_3, window_bounds = array<i64: 32, 96>}, {pipeline_mode = #tpu.pipeline_mode<synchronous>, transform_indices = @transform_4, window_bounds = array<i64: 1, 96>}, {pipeline_mode = #tpu.pipeline_mode<synchronous>, transform_indices = @transform_5, window_bounds = array<i64: 4, 8, 32>}, {pipeline_mode = #tpu.pipeline_mode<synchronous>, transform_indices = @transform_6, window_bounds = array<i64: 1, 32>}, {pipeline_mode = #tpu.pipeline_mode<synchronous>, transform_indices = @transform_7, window_bounds = array<i64: 1, 32>}, {pipeline_mode = #tpu.pipeline_mode<synchronous>, transform_indices = @transform_8, window_bounds = array<i64: 1, 32>}, {pipeline_mode = #tpu.pipeline_mode<synchronous>, transform_indices = @transform_9, window_bounds = array<i64: 32, 128>}, {pipeline_mode = #tpu.pipeline_mode<synchronous>, transform_indices = @transform_10, window_bounds = array<i64: 1, 128>}, {pipeline_mode = #tpu.pipeline_mode<synchronous>, transform_indices = @transform_11, window_bounds = array<i64: 128, 32>}, {pipeline_mode = #tpu.pipeline_mode<synchronous>, transform_indices = @transform_12, window_bounds = array<i64: 1, 32>}, {transform_indices = @transform_13, window_bounds = array<i64: 1, 8, 32>}]} {
    %0 = tpu.iota {dimensions = array<i32: 0>} : vector<8x8xi32>
    %1 = tpu.iota {dimensions = array<i32: 1>} : vector<8x8xi32>
    %2 = arith.cmpi sgt, %1, %0 : vector<8x8xi32>
    %c0 = arith.constant 0 : index
    %c0_0 = arith.constant 0 : index
    %3 = vector.load %arg2[%c0, %c0_0] : memref<1x32xf32, #tpu.memory_space<vmem>>, vector<1x32xf32>
    %c0_1 = arith.constant 0 : index
    %c0_2 = arith.constant 0 : index
    %4 = vector.load %arg3[%c0_1, %c0_2] : memref<1x32xf32, #tpu.memory_space<vmem>>, vector<1x32xf32>
    %c0_3 = arith.constant 0 : index
    %c0_4 = arith.constant 0 : index
    %5 = vector.load %arg8[%c0_3, %c0_4] : memref<1x32xf32, #tpu.memory_space<vmem>>, vector<1x32xf32>
    %c0_5 = arith.constant 0 : index
    %c0_6 = arith.constant 0 : index
    %6 = vector.load %arg9[%c0_5, %c0_6] : memref<1x32xf32, #tpu.memory_space<vmem>>, vector<1x32xf32>
    %c0_7 = arith.constant 0 : index
    %c0_8 = arith.constant 0 : index
    %7 = vector.load %arg4[%c0_7, %c0_8] : memref<32x96xbf16, #tpu.memory_space<vmem>>, vector<32x96xbf16>
    %c0_9 = arith.constant 0 : index
    %c0_10 = arith.constant 0 : index
    %8 = vector.load %arg5[%c0_9, %c0_10] : memref<1x96xf32, #tpu.memory_space<vmem>>, vector<1x96xf32>
    %c0_11 = arith.constant 0 : index
    %c0_12 = arith.constant 0 : index
    %9 = vector.load %arg7[%c0_11, %c0_12] : memref<1x32xf32, #tpu.memory_space<vmem>>, vector<1x32xf32>
    %c0_13 = arith.constant 0 : index
    %c0_14 = arith.constant 0 : index
    %10 = vector.load %arg10[%c0_13, %c0_14] : memref<32x128xbf16, #tpu.memory_space<vmem>>, vector<32x128xbf16>
    %c0_15 = arith.constant 0 : index
    %c0_16 = arith.constant 0 : index
    %11 = vector.load %arg11[%c0_15, %c0_16] : memref<1x128xf32, #tpu.memory_space<vmem>>, vector<1x128xf32>
    %c0_17 = arith.constant 0 : index
    %c0_18 = arith.constant 0 : index
    %12 = vector.load %arg12[%c0_17, %c0_18] : memref<128x32xbf16, #tpu.memory_space<vmem>>, vector<128x32xbf16>
    %c0_19 = arith.constant 0 : index
    %c0_20 = arith.constant 0 : index
    %13 = vector.load %arg13[%c0_19, %c0_20] : memref<1x32xf32, #tpu.memory_space<vmem>>, vector<1x32xf32>
    %c0_21 = arith.constant 0 : index
    %c0_22 = arith.constant 0 : index
    %c0_23 = arith.constant 0 : index
    %14 = vector.load %arg1[%c0_21, %c0_22, %c0_23] : memref<1x8x32xf32, #tpu.memory_space<vmem>>, vector<1x8x32xf32>
    %15 = vector.shape_cast %14 : vector<1x8x32xf32> to vector<8x32xf32>
    %cst = arith.constant dense<0.000000e+00> : vector<8xf32>
    %16 = vector.multi_reduction <add>, %15, %cst [1] : vector<8x32xf32> to vector<8xf32>
    %17 = vector.shape_cast %16 : vector<8xf32> to vector<8x1xf32>
    %cst_24 = arith.constant 3.200000e+01 : f32
    %18 = vector.broadcast %cst_24 : f32 to vector<8x1xf32>
    %19 = arith.divf %17, %18 : vector<8x1xf32>
    %20 = vector.broadcast %19 : vector<8x1xf32> to vector<8x32xf32>
    %21 = arith.subf %15, %20 : vector<8x32xf32>
    %22 = arith.mulf %21, %21 : vector<8x32xf32>
    %cst_25 = arith.constant dense<0.000000e+00> : vector<8xf32>
    %23 = vector.multi_reduction <add>, %22, %cst_25 [1] : vector<8x32xf32> to vector<8xf32>
    %24 = vector.shape_cast %23 : vector<8xf32> to vector<8x1xf32>
    %cst_26 = arith.constant 3.200000e+01 : f32
    %25 = vector.broadcast %cst_26 : f32 to vector<8x1xf32>
    %26 = arith.divf %24, %25 : vector<8x1xf32>
    %27 = vector.broadcast %19 : vector<8x1xf32> to vector<8x32xf32>
    %28 = arith.subf %15, %27 : vector<8x32xf32>
    %cst_27 = arith.constant 9.99999974E-6 : f32
    %29 = vector.broadcast %cst_27 : f32 to vector<8x1xf32>
    %30 = arith.addf %26, %29 : vector<8x1xf32>
    %31 = math.rsqrt %30 : vector<8x1xf32>
    %32 = vector.broadcast %31 : vector<8x1xf32> to vector<8x32xf32>
    %33 = arith.mulf %28, %32 : vector<8x32xf32>
    %34 = vector.broadcast %3 : vector<1x32xf32> to vector<8x32xf32>
    %35 = arith.mulf %33, %34 : vector<8x32xf32>
    %36 = vector.broadcast %4 : vector<1x32xf32> to vector<8x32xf32>
    %37 = arith.addf %35, %36 : vector<8x32xf32>
    %38 = arith.truncf %37 : vector<8x32xf32> to vector<8x32xbf16>
    %cst_28 = arith.constant dense<0.000000e+00> : vector<8x96xf32>
    %39 = tpu.matmul %38, %7, %cst_28 {dimension_numbers = #tpu.dot_dimension_numbers<[1], [0], [0], [1], [0, 0, 1, 1], [], []>} : vector<8x32xbf16>, vector<32x96xbf16>, vector<8x96xf32> -> vector<8x96xf32>
    %40 = vector.broadcast %8 : vector<1x96xf32> to vector<8x96xf32>
    %41 = arith.addf %39, %40 : vector<8x96xf32>
    %cst_29 = arith.constant 0.000000e+00 : f32
    %42 = vector.broadcast %cst_29 : f32 to vector<8x32xf32>
    %43 = vector.extract_strided_slice %41 {offsets = [0, 0], sizes = [8, 8], strides = [1, 1]} : vector<8x96xf32> to vector<8x8xf32>
    %44 = arith.truncf %43 : vector<8x8xf32> to vector<8x8xbf16>
    %45 = vector.extract_strided_slice %41 {offsets = [0, 32], sizes = [8, 8], strides = [1, 1]} : vector<8x96xf32> to vector<8x8xf32>
    %46 = arith.truncf %45 : vector<8x8xf32> to vector<8x8xbf16>
    %47 = vector.extract_strided_slice %41 {offsets = [0, 64], sizes = [8, 8], strides = [1, 1]} : vector<8x96xf32> to vector<8x8xf32>
    %48 = arith.truncf %47 : vector<8x8xf32> to vector<8x8xbf16>
    "tpu.trace_start"() <{level = 10 : i32, message = "qd,kd->qk"}> : () -> ()
    %cst_30 = arith.constant dense<0.000000e+00> : vector<8x8xf32>
    %49 = tpu.matmul %44, %46, %cst_30 {dimension_numbers = #tpu.dot_dimension_numbers<[1], [1], [0], [0], [0, 0, 1, 0], [], []>} : vector<8x8xbf16>, vector<8x8xbf16>, vector<8x8xf32> -> vector<8x8xf32>
    %cst_31 = arith.constant 0xFF800000 : f32
    "tpu.trace_stop"() : () -> ()
    %50 = vector.broadcast %cst_31 : f32 to vector<8x8xf32>
    %51 = arith.select %2, %50, %49 : vector<8x8xi1>, vector<8x8xf32>
    %cst_32 = arith.constant dense<0xFF800000> : vector<8xf32>
    %52 = vector.multi_reduction <maximumf>, %51, %cst_32 [1] : vector<8x8xf32> to vector<8xf32>
    %53 = vector.shape_cast %52 : vector<8xf32> to vector<8x1xf32>
    %54 = vector.broadcast %53 : vector<8x1xf32> to vector<8x8xf32>
    %55 = arith.subf %51, %54 : vector<8x8xf32>
    %56 = math.exp %55 : vector<8x8xf32>
    %cst_33 = arith.constant dense<0.000000e+00> : vector<8xf32>
    %57 = vector.multi_reduction <add>, %56, %cst_33 [1] : vector<8x8xf32> to vector<8xf32>
    %58 = vector.shape_cast %57 : vector<8xf32> to vector<8x1xf32>
    %59 = tpu.reciprocal %58 {approx = true} : vector<8x1xf32> -> vector<8x1xf32>
    %60 = vector.broadcast %59 : vector<8x1xf32> to vector<8x8xf32>
    %61 = arith.mulf %56, %60 : vector<8x8xf32>
    %62 = arith.truncf %61 : vector<8x8xf32> to vector<8x8xbf16>
    %cst_34 = arith.constant dense<0.000000e+00> : vector<8x8xf32>
    %63 = tpu.matmul %62, %48, %cst_34 {dimension_numbers = #tpu.dot_dimension_numbers<[1], [0], [0], [1], [0, 0, 1, 1], [], []>} : vector<8x8xbf16>, vector<8x8xbf16>, vector<8x8xf32> -> vector<8x8xf32>
    %64 = arith.truncf %63 : vector<8x8xf32> to vector<8x8xbf16>
    %c0_35 = arith.constant 0 : index
    %c0_36 = arith.constant 0 : index
    %c0_37 = arith.constant 0 : index
    %65 = vector.load %arg6[%c0_35, %c0_36, %c0_37] : memref<4x8x32xbf16, #tpu.memory_space<vmem>>, vector<1x8x32xbf16>
    %66 = vector.shape_cast %65 : vector<1x8x32xbf16> to vector<8x32xbf16>
    %cst_38 = arith.constant dense<0.000000e+00> : vector<8x32xf32>
    %67 = tpu.matmul %64, %66, %cst_38 {dimension_numbers = #tpu.dot_dimension_numbers<[1], [0], [0], [1], [0, 0, 1, 1], [], []>} : vector<8x8xbf16>, vector<8x32xbf16>, vector<8x32xf32> -> vector<8x32xf32>
    %68 = arith.addf %42, %67 : vector<8x32xf32>
    %69 = vector.extract_strided_slice %41 {offsets = [0, 8], sizes = [8, 8], strides = [1, 1]} : vector<8x96xf32> to vector<8x8xf32>
    %70 = arith.truncf %69 : vector<8x8xf32> to vector<8x8xbf16>
    %71 = vector.extract_strided_slice %41 {offsets = [0, 40], sizes = [8, 8], strides = [1, 1]} : vector<8x96xf32> to vector<8x8xf32>
    %72 = arith.truncf %71 : vector<8x8xf32> to vector<8x8xbf16>
    %73 = vector.extract_strided_slice %41 {offsets = [0, 72], sizes = [8, 8], strides = [1, 1]} : vector<8x96xf32> to vector<8x8xf32>
    %74 = arith.truncf %73 : vector<8x8xf32> to vector<8x8xbf16>
    "tpu.trace_start"() <{level = 10 : i32, message = "qd,kd->qk"}> : () -> ()
    %cst_39 = arith.constant dense<0.000000e+00> : vector<8x8xf32>
    %75 = tpu.matmul %70, %72, %cst_39 {dimension_numbers = #tpu.dot_dimension_numbers<[1], [1], [0], [0], [0, 0, 1, 0], [], []>} : vector<8x8xbf16>, vector<8x8xbf16>, vector<8x8xf32> -> vector<8x8xf32>
    %cst_40 = arith.constant 0xFF800000 : f32
    "tpu.trace_stop"() : () -> ()
    %76 = vector.broadcast %cst_40 : f32 to vector<8x8xf32>
    %77 = arith.select %2, %76, %75 : vector<8x8xi1>, vector<8x8xf32>
    %cst_41 = arith.constant dense<0xFF800000> : vector<8xf32>
    %78 = vector.multi_reduction <maximumf>, %77, %cst_41 [1] : vector<8x8xf32> to vector<8xf32>
    %79 = vector.shape_cast %78 : vector<8xf32> to vector<8x1xf32>
    %80 = vector.broadcast %79 : vector<8x1xf32> to vector<8x8xf32>
    %81 = arith.subf %77, %80 : vector<8x8xf32>
    %82 = math.exp %81 : vector<8x8xf32>
    %cst_42 = arith.constant dense<0.000000e+00> : vector<8xf32>
    %83 = vector.multi_reduction <add>, %82, %cst_42 [1] : vector<8x8xf32> to vector<8xf32>
    %84 = vector.shape_cast %83 : vector<8xf32> to vector<8x1xf32>
    %85 = tpu.reciprocal %84 {approx = true} : vector<8x1xf32> -> vector<8x1xf32>
    %86 = vector.broadcast %85 : vector<8x1xf32> to vector<8x8xf32>
    %87 = arith.mulf %82, %86 : vector<8x8xf32>
    %88 = arith.truncf %87 : vector<8x8xf32> to vector<8x8xbf16>
    %cst_43 = arith.constant dense<0.000000e+00> : vector<8x8xf32>
    %89 = tpu.matmul %88, %74, %cst_43 {dimension_numbers = #tpu.dot_dimension_numbers<[1], [0], [0], [1], [0, 0, 1, 1], [], []>} : vector<8x8xbf16>, vector<8x8xbf16>, vector<8x8xf32> -> vector<8x8xf32>
    %90 = arith.truncf %89 : vector<8x8xf32> to vector<8x8xbf16>
    %c1 = arith.constant 1 : index
    %c0_44 = arith.constant 0 : index
    %c0_45 = arith.constant 0 : index
    %91 = vector.load %arg6[%c1, %c0_44, %c0_45] : memref<4x8x32xbf16, #tpu.memory_space<vmem>>, vector<1x8x32xbf16>
    %92 = vector.shape_cast %91 : vector<1x8x32xbf16> to vector<8x32xbf16>
    %cst_46 = arith.constant dense<0.000000e+00> : vector<8x32xf32>
    %93 = tpu.matmul %90, %92, %cst_46 {dimension_numbers = #tpu.dot_dimension_numbers<[1], [0], [0], [1], [0, 0, 1, 1], [], []>} : vector<8x8xbf16>, vector<8x32xbf16>, vector<8x32xf32> -> vector<8x32xf32>
    %94 = arith.addf %68, %93 : vector<8x32xf32>
    %95 = vector.extract_strided_slice %41 {offsets = [0, 16], sizes = [8, 8], strides = [1, 1]} : vector<8x96xf32> to vector<8x8xf32>
    %96 = arith.truncf %95 : vector<8x8xf32> to vector<8x8xbf16>
    %97 = vector.extract_strided_slice %41 {offsets = [0, 48], sizes = [8, 8], strides = [1, 1]} : vector<8x96xf32> to vector<8x8xf32>
    %98 = arith.truncf %97 : vector<8x8xf32> to vector<8x8xbf16>
    %99 = vector.extract_strided_slice %41 {offsets = [0, 80], sizes = [8, 8], strides = [1, 1]} : vector<8x96xf32> to vector<8x8xf32>
    %100 = arith.truncf %99 : vector<8x8xf32> to vector<8x8xbf16>
    "tpu.trace_start"() <{level = 10 : i32, message = "qd,kd->qk"}> : () -> ()
    %cst_47 = arith.constant dense<0.000000e+00> : vector<8x8xf32>
    %101 = tpu.matmul %96, %98, %cst_47 {dimension_numbers = #tpu.dot_dimension_numbers<[1], [1], [0], [0], [0, 0, 1, 0], [], []>} : vector<8x8xbf16>, vector<8x8xbf16>, vector<8x8xf32> -> vector<8x8xf32>
    %cst_48 = arith.constant 0xFF800000 : f32
    "tpu.trace_stop"() : () -> ()
    %102 = vector.broadcast %cst_48 : f32 to vector<8x8xf32>
    %103 = arith.select %2, %102, %101 : vector<8x8xi1>, vector<8x8xf32>
    %cst_49 = arith.constant dense<0xFF800000> : vector<8xf32>
    %104 = vector.multi_reduction <maximumf>, %103, %cst_49 [1] : vector<8x8xf32> to vector<8xf32>
    %105 = vector.shape_cast %104 : vector<8xf32> to vector<8x1xf32>
    %106 = vector.broadcast %105 : vector<8x1xf32> to vector<8x8xf32>
    %107 = arith.subf %103, %106 : vector<8x8xf32>
    %108 = math.exp %107 : vector<8x8xf32>
    %cst_50 = arith.constant dense<0.000000e+00> : vector<8xf32>
    %109 = vector.multi_reduction <add>, %108, %cst_50 [1] : vector<8x8xf32> to vector<8xf32>
    %110 = vector.shape_cast %109 : vector<8xf32> to vector<8x1xf32>
    %111 = tpu.reciprocal %110 {approx = true} : vector<8x1xf32> -> vector<8x1xf32>
    %112 = vector.broadcast %111 : vector<8x1xf32> to vector<8x8xf32>
    %113 = arith.mulf %108, %112 : vector<8x8xf32>
    %114 = arith.truncf %113 : vector<8x8xf32> to vector<8x8xbf16>
    %cst_51 = arith.constant dense<0.000000e+00> : vector<8x8xf32>
    %115 = tpu.matmul %114, %100, %cst_51 {dimension_numbers = #tpu.dot_dimension_numbers<[1], [0], [0], [1], [0, 0, 1, 1], [], []>} : vector<8x8xbf16>, vector<8x8xbf16>, vector<8x8xf32> -> vector<8x8xf32>
    %116 = arith.truncf %115 : vector<8x8xf32> to vector<8x8xbf16>
    %c2 = arith.constant 2 : index
    %c0_52 = arith.constant 0 : index
    %c0_53 = arith.constant 0 : index
    %117 = vector.load %arg6[%c2, %c0_52, %c0_53] : memref<4x8x32xbf16, #tpu.memory_space<vmem>>, vector<1x8x32xbf16>
    %118 = vector.shape_cast %117 : vector<1x8x32xbf16> to vector<8x32xbf16>
    %cst_54 = arith.constant dense<0.000000e+00> : vector<8x32xf32>
    %119 = tpu.matmul %116, %118, %cst_54 {dimension_numbers = #tpu.dot_dimension_numbers<[1], [0], [0], [1], [0, 0, 1, 1], [], []>} : vector<8x8xbf16>, vector<8x32xbf16>, vector<8x32xf32> -> vector<8x32xf32>
    %120 = arith.addf %94, %119 : vector<8x32xf32>
    %121 = vector.extract_strided_slice %41 {offsets = [0, 24], sizes = [8, 8], strides = [1, 1]} : vector<8x96xf32> to vector<8x8xf32>
    %122 = arith.truncf %121 : vector<8x8xf32> to vector<8x8xbf16>
    %123 = vector.extract_strided_slice %41 {offsets = [0, 56], sizes = [8, 8], strides = [1, 1]} : vector<8x96xf32> to vector<8x8xf32>
    %124 = arith.truncf %123 : vector<8x8xf32> to vector<8x8xbf16>
    %125 = vector.extract_strided_slice %41 {offsets = [0, 88], sizes = [8, 8], strides = [1, 1]} : vector<8x96xf32> to vector<8x8xf32>
    %126 = arith.truncf %125 : vector<8x8xf32> to vector<8x8xbf16>
    "tpu.trace_start"() <{level = 10 : i32, message = "qd,kd->qk"}> : () -> ()
    %cst_55 = arith.constant dense<0.000000e+00> : vector<8x8xf32>
    %127 = tpu.matmul %122, %124, %cst_55 {dimension_numbers = #tpu.dot_dimension_numbers<[1], [1], [0], [0], [0, 0, 1, 0], [], []>} : vector<8x8xbf16>, vector<8x8xbf16>, vector<8x8xf32> -> vector<8x8xf32>
    %cst_56 = arith.constant 0xFF800000 : f32
    "tpu.trace_stop"() : () -> ()
    %128 = vector.broadcast %cst_56 : f32 to vector<8x8xf32>
    %129 = arith.select %2, %128, %127 : vector<8x8xi1>, vector<8x8xf32>
    %cst_57 = arith.constant dense<0xFF800000> : vector<8xf32>
    %130 = vector.multi_reduction <maximumf>, %129, %cst_57 [1] : vector<8x8xf32> to vector<8xf32>
    %131 = vector.shape_cast %130 : vector<8xf32> to vector<8x1xf32>
    %132 = vector.broadcast %131 : vector<8x1xf32> to vector<8x8xf32>
    %133 = arith.subf %129, %132 : vector<8x8xf32>
    %134 = math.exp %133 : vector<8x8xf32>
    %cst_58 = arith.constant dense<0.000000e+00> : vector<8xf32>
    %135 = vector.multi_reduction <add>, %134, %cst_58 [1] : vector<8x8xf32> to vector<8xf32>
    %136 = vector.shape_cast %135 : vector<8xf32> to vector<8x1xf32>
    %137 = tpu.reciprocal %136 {approx = true} : vector<8x1xf32> -> vector<8x1xf32>
    %138 = vector.broadcast %137 : vector<8x1xf32> to vector<8x8xf32>
    %139 = arith.mulf %134, %138 : vector<8x8xf32>
    %140 = arith.truncf %139 : vector<8x8xf32> to vector<8x8xbf16>
    %cst_59 = arith.constant dense<0.000000e+00> : vector<8x8xf32>
    %141 = tpu.matmul %140, %126, %cst_59 {dimension_numbers = #tpu.dot_dimension_numbers<[1], [0], [0], [1], [0, 0, 1, 1], [], []>} : vector<8x8xbf16>, vector<8x8xbf16>, vector<8x8xf32> -> vector<8x8xf32>
    %142 = arith.truncf %141 : vector<8x8xf32> to vector<8x8xbf16>
    %c3 = arith.constant 3 : index
    %c0_60 = arith.constant 0 : index
    %c0_61 = arith.constant 0 : index
    %143 = vector.load %arg6[%c3, %c0_60, %c0_61] : memref<4x8x32xbf16, #tpu.memory_space<vmem>>, vector<1x8x32xbf16>
    %144 = vector.shape_cast %143 : vector<1x8x32xbf16> to vector<8x32xbf16>
    %cst_62 = arith.constant dense<0.000000e+00> : vector<8x32xf32>
    %145 = tpu.matmul %142, %144, %cst_62 {dimension_numbers = #tpu.dot_dimension_numbers<[1], [0], [0], [1], [0, 0, 1, 1], [], []>} : vector<8x8xbf16>, vector<8x32xbf16>, vector<8x32xf32> -> vector<8x32xf32>
    %146 = arith.addf %120, %145 : vector<8x32xf32>
    %147 = vector.broadcast %9 : vector<1x32xf32> to vector<8x32xf32>
    %148 = arith.addf %146, %147 : vector<8x32xf32>
    %149 = arith.addf %148, %15 : vector<8x32xf32>
    %cst_63 = arith.constant dense<0.000000e+00> : vector<8xf32>
    %150 = vector.multi_reduction <add>, %149, %cst_63 [1] : vector<8x32xf32> to vector<8xf32>
    %151 = vector.shape_cast %150 : vector<8xf32> to vector<8x1xf32>
    %cst_64 = arith.constant 3.200000e+01 : f32
    %152 = vector.broadcast %cst_64 : f32 to vector<8x1xf32>
    %153 = arith.divf %151, %152 : vector<8x1xf32>
    %154 = vector.broadcast %153 : vector<8x1xf32> to vector<8x32xf32>
    %155 = arith.subf %149, %154 : vector<8x32xf32>
    %156 = arith.mulf %155, %155 : vector<8x32xf32>
    %cst_65 = arith.constant dense<0.000000e+00> : vector<8xf32>
    %157 = vector.multi_reduction <add>, %156, %cst_65 [1] : vector<8x32xf32> to vector<8xf32>
    %158 = vector.shape_cast %157 : vector<8xf32> to vector<8x1xf32>
    %cst_66 = arith.constant 3.200000e+01 : f32
    %159 = vector.broadcast %cst_66 : f32 to vector<8x1xf32>
    %160 = arith.divf %158, %159 : vector<8x1xf32>
    %161 = vector.broadcast %153 : vector<8x1xf32> to vector<8x32xf32>
    %162 = arith.subf %149, %161 : vector<8x32xf32>
    %cst_67 = arith.constant 9.99999974E-6 : f32
    %163 = vector.broadcast %cst_67 : f32 to vector<8x1xf32>
    %164 = arith.addf %160, %163 : vector<8x1xf32>
    %165 = math.rsqrt %164 : vector<8x1xf32>
    %166 = vector.broadcast %165 : vector<8x1xf32> to vector<8x32xf32>
    %167 = arith.mulf %162, %166 : vector<8x32xf32>
    %168 = vector.broadcast %5 : vector<1x32xf32> to vector<8x32xf32>
    %169 = arith.mulf %167, %168 : vector<8x32xf32>
    %170 = vector.broadcast %6 : vector<1x32xf32> to vector<8x32xf32>
    %171 = arith.addf %169, %170 : vector<8x32xf32>
    %172 = arith.truncf %171 : vector<8x32xf32> to vector<8x32xbf16>
    %cst_68 = arith.constant dense<0.000000e+00> : vector<8x128xf32>
    %173 = tpu.matmul %172, %10, %cst_68 {dimension_numbers = #tpu.dot_dimension_numbers<[1], [0], [0], [1], [0, 0, 1, 1], [], []>} : vector<8x32xbf16>, vector<32x128xbf16>, vector<8x128xf32> -> vector<8x128xf32>
    %174 = vector.broadcast %11 : vector<1x128xf32> to vector<8x128xf32>
    %175 = arith.addf %173, %174 : vector<8x128xf32>
    %cst_69 = arith.constant 1.702000e+00 : f32
    %176 = vector.broadcast %cst_69 : f32 to vector<8x128xf32>
    %177 = arith.mulf %176, %175 : vector<8x128xf32>
    %178 = arith.negf %177 : vector<8x128xf32>
    %179 = math.exp %178 : vector<8x128xf32>
    %cst_70 = arith.constant 1.000000e+00 : f32
    %180 = vector.broadcast %cst_70 : f32 to vector<8x128xf32>
    %181 = arith.addf %180, %179 : vector<8x128xf32>
    %182 = arith.divf %180, %181 : vector<8x128xf32>
    %183 = arith.mulf %175, %182 : vector<8x128xf32>
    %184 = arith.truncf %183 : vector<8x128xf32> to vector<8x128xbf16>
    %cst_71 = arith.constant dense<0.000000e+00> : vector<8x32xf32>
    %185 = tpu.matmul %184, %12, %cst_71 {dimension_numbers = #tpu.dot_dimension_numbers<[1], [0], [0], [1], [0, 0, 1, 1], [], []>} : vector<8x128xbf16>, vector<128x32xbf16>, vector<8x32xf32> -> vector<8x32xf32>
    %186 = vector.broadcast %13 : vector<1x32xf32> to vector<8x32xf32>
    %187 = arith.addf %185, %186 : vector<8x32xf32>
    %188 = arith.addf %187, %149 : vector<8x32xf32>
    %c0_72 = arith.constant 0 : index
    %c0_73 = arith.constant 0 : index
    %c0_74 = arith.constant 0 : index
    %189 = vector.load %arg14[%c0_72, %c0_73, %c0_74] : memref<1x8x32xf32, #tpu.memory_space<vmem>>, vector<1x8x32xf32>
    %190 = vector.shape_cast %189 : vector<1x8x32xf32> to vector<8x32xf32>
    %191 = vector.shape_cast %188 : vector<8x32xf32> to vector<1x8x32xf32>
    tpu.vector_store %arg14[%c0_72, %c0_73, %c0_74], %191 {strides = array<i32>} : memref<1x8x32xf32, #tpu.memory_space<vmem>>, vector<1x8x32xf32>,
    return
  }
  func.func @transform_0(%arg0: i32) -> (i32, i32, i32) {
    %c0_i32 = arith.constant 0 : i32
    %c0_i32_0 = arith.constant 0 : i32
    %c0_i32_1 = arith.constant 0 : i32
    return %arg0, %c0_i32, %c0_i32_0 : i32, i32, i32
  }
  func.func @transform_1(%arg0: i32) -> (i32, i32) {
    %c0_i32 = arith.constant 0 : i32
    %c0_i32_0 = arith.constant 0 : i32
    %c0_i32_1 = arith.constant 0 : i32
    return %c0_i32, %c0_i32_0 : i32, i32
  }
  func.func @transform_2(%arg0: i32) -> (i32, i32) {
    %c0_i32 = arith.constant 0 : i32
    %c0_i32_0 = arith.constant 0 : i32
    %c0_i32_1 = arith.constant 0 : i32
    return %c0_i32, %c0_i32_0 : i32, i32
  }
  func.func @transform_3(%arg0: i32) -> (i32, i32) {
    %c0_i32 = arith.constant 0 : i32
    %c0_i32_0 = arith.constant 0 : i32
    %c0_i32_1 = arith.constant 0 : i32
    return %c0_i32, %c0_i32_0 : i32, i32
  }
  func.func @transform_4(%arg0: i32) -> (i32, i32) {
    %c0_i32 = arith.constant 0 : i32
    %c0_i32_0 = arith.constant 0 : i32
    %c0_i32_1 = arith.constant 0 : i32
    return %c0_i32, %c0_i32_0 : i32, i32
  }
  func.func @transform_5(%arg0: i32) -> (i32, i32, i32) {
    %c0_i32 = arith.constant 0 : i32
    %c0_i32_0 = arith.constant 0 : i32
    %c0_i32_1 = arith.constant 0 : i32
    %c0_i32_2 = arith.constant 0 : i32
    return %c0_i32, %c0_i32_0, %c0_i32_1 : i32, i32, i32
  }
  func.func @transform_6(%arg0: i32) -> (i32, i32) {
    %c0_i32 = arith.constant 0 : i32
    %c0_i32_0 = arith.constant 0 : i32
    %c0_i32_1 = arith.constant 0 : i32
    return %c0_i32, %c0_i32_0 : i32, i32
  }
  func.func @transform_7(%arg0: i32) -> (i32, i32) {
    %c0_i32 = arith.constant 0 : i32
    %c0_i32_0 = arith.constant 0 : i32
    %c0_i32_1 = arith.constant 0 : i32
    return %c0_i32, %c0_i32_0 : i32, i32
  }
  func.func @transform_8(%arg0: i32) -> (i32, i32) {
    %c0_i32 = arith.constant 0 : i32
    %c0_i32_0 = arith.constant 0 : i32
    %c0_i32_1 = arith.constant 0 : i32
    return %c0_i32, %c0_i32_0 : i32, i32
  }
  func.func @transform_9(%arg0: i32) -> (i32, i32) {
    %c0_i32 = arith.constant 0 : i32
    %c0_i32_0 = arith.constant 0 : i32
    %c0_i32_1 = arith.constant 0 : i32
    return %c0_i32, %c0_i32_0 : i32, i32
  }
  func.func @transform_10(%arg0: i32) -> (i32, i32) {
    %c0_i32 = arith.constant 0 : i32
    %c0_i32_0 = arith.constant 0 : i32
    %c0_i32_1 = arith.constant 0 : i32
    return %c0_i32, %c0_i32_0 : i32, i32
  }
  func.func @transform_11(%arg0: i32) -> (i32, i32) {
    %c0_i32 = arith.constant 0 : i32
    %c0_i32_0 = arith.constant 0 : i32
    %c0_i32_1 = arith.constant 0 : i32
    return %c0_i32, %c0_i32_0 : i32, i32
  }
  func.func @transform_12(%arg0: i32) -> (i32, i32) {
    %c0_i32 = arith.constant 0 : i32
    %c0_i32_0 = arith.constant 0 : i32
    %c0_i32_1 = arith.constant 0 : i32
    return %c0_i32, %c0_i32_0 : i32, i32
  }
  func.func @transform_13(%arg0: i32) -> (i32, i32, i32) {
    %c0_i32 = arith.constant 0 : i32
    %c0_i32_0 = arith.constant 0 : i32
    %c0_i32_1 = arith.constant 0 : i32
    return %arg0, %c0_i32, %c0_i32_0 : i32, i32, i32
  }
}

</mosaic_0001>

<bundles_post_ra>
// kernel: tpu_custom_call.1
= control target key start
LH: loop header
LB: loop body
LE: loop exit
PB: predicated region body
PF: predicated region fallthrough
CT: control target
= control target key end

     0   :  { %s1660_s0 = inlined_call_operand.vmem [shape: f32[2,8,32], index: 0, kind: input, shape index: {}]   ;;  %s1661_s1 = inlined_call_operand.vmem [shape: f32[1,32], index: 1, kind: input, shape index: {}]   ;;  %s1662_s2 = inlined_call_operand.vmem [shape: f32[1,32], index: 2, kind: input, shape index: {}]   ;;  %s1663_s3 = inlined_call_operand.vmem [shape: bf16[32,96], index: 3, kind: input, shape index: {}]   ;;  %s1664_s4 = inlined_call_operand.vmem [shape: f32[1,96], index: 4, kind: input, shape index: {}]   ;;  %s1665_s5 = inlined_call_operand.vmem [shape: bf16[4,8,32], index: 5, kind: input, shape index: {}]   ;;  %s1666_s6 = inlined_call_operand.vmem [shape: f32[1,32], index: 6, kind: input, shape index: {}]   ;;  %s1667_s7 = inlined_call_operand.vmem [shape: f32[1,32], index: 7, kind: input, shape index: {}]   ;;  %s1668_s8 = inlined_call_operand.vmem [shape: f32[1,32], index: 8, kind: input, shape index: {}]   ;;  %s1669_s9 = inlined_call_operand.vmem [shape: bf16[32,128], index: 9, kind: input, shape index: {}]   ;;  %s1670_s10 = inlined_call_operand.vmem [shape: f32[1,128], index: 10, kind: input, shape index: {}]   ;;  %s1671_s11 = inlined_call_operand.vmem [shape: bf16[128,32], index: 11, kind: input, shape index: {}]   ;;  %s1672_s12 = inlined_call_operand.vmem [shape: f32[1,32], index: 12, kind: input, shape index: {}]   ;;  %s1673_s13 = inlined_call_operand.hbm [shape: f32[2,8,32], index: 13, kind: output, shape index: {}]  }
   0x1   :  { %1674 = sst [smem:[#allocation5_spill]] %s1660_s0 }
   0x2   :  { %1675 = sst [smem:[#allocation6_spill]] %s1661_s1 }
   0x3   :  { %1676 = sst [smem:[#allocation7_spill]] %s1662_s2 }
   0x4   :  { %1677 = sst [smem:[#allocation8_spill]] %s1663_s3 }
   0x5   :  { %18 = vsyncpa [#allocation3], 0 }
   0x6   :  { %20 = vsyncpa [#allocation3 + $0x1], 0  ;;  %s1413_s25 = smov 0   ;;  %s1415_s26 = smov 0  }
   0x7   :  { %s1417_s27 = smov 0   ;;  %s1419_s28 = smov 0  }
   0x8 LB: > { %s1434_s29 = sadd.s32 4294967295, %s1329_s28   ;;  %s1094_s30 = sadd.s32 4294967294, %s1329_s28   ;;  %s1329_s28 = sphi %s1419_s28, %s1687_s28   ;;  %s1325_s27 = sphi %s1417_s27, %s1686_s27   ;;  %s1321_s26 = sphi %s1415_s26, %s1685_s26   ;;  %s1317_s25 = sphi %s1413_s25, %s1684_s25  }
   0x9   : > { %s1438_s14 = sadd.s32 1, %s1329_s28   ;;  %s311_s15 = sadd.s32 1, %s1325_s27 }
   0xa   : > { %s308_s16 = ssub.s32 %s1329_s28, %s1438_s14  ;;  %p321_p0 = scmp.ne.s32.totalorder %s1325_s27, %s1321_s26 }
   0xb   : > { %p309_p1 = scmp.eq.s32.totalorder %s308_s16, 0  ;;  %p322_p2 = scmp.eq.s32.totalorder %s1434_s29, 1 }
   0xc   : > { %p327_p3 = scmp.ne.s32.totalorder %s1321_s26, %s1317_s25  ;;  %p328_p4 = scmp.eq.s32.totalorder %s1094_s30, 1 }
   0xd   : > { %s1449_s17 = scalar_select %p309_p1, %s1325_s27, %s311_s15  }
   0xe   : > { %p1451_p5 = por %p322_p2, %p321_p0  ;;  %p1455_p6 = por %p328_p4, %p327_p3 }
   0xf   : > { %p1097_p7 = scmp.ge.s32.totalorder %s1329_s28, 1  ;;  %p389_p8 = scmp.lt.s32.totalorder %s1329_s28, 3 }
  0x11   : > { %p390_p9 = pnand %p1097_p7, %p389_p8 }
  0x12   : > { %p432_p10 = scmp.lt.s32.totalorder (!%p390_p9), %s1434_s29, 1  ;;  %s1680_s0 = sld [smem:[#allocation5_spill]] (!%p390_p9) }
  0x13   : > { %393 = sbr.rel (%p390_p9) target bundleno = 2313 (0x909), region = 72  ;;  %s1681_s3 = sld [smem:[#allocation8_spill]] (!%p390_p9) }
  0x14   : > { %s1682_s1 = sld [smem:[#allocation6_spill]] (!%p390_p9)  ;;  %s1332_s16 = smov (!%p390_p9), 88  }
  0x15   : > { %s1683_s2 = sld [smem:[#allocation7_spill]] (!%p390_p9)  ;;  %s1335_s22 = smov (!%p390_p9), 112  }
  0x16   : > { %s1336_s23 = smov (!%p390_p9), 64   ;;  %s1338_s30 = smov (!%p390_p9), 72  }
  0x17   : > { %s1339_s15 = smov (!%p390_p9), 104  }
  0x18   : > { %s433_s20 = scalar_select %p432_p10, %s1434_s29, 1  ;;  %vm475_vm0 = vcmask 261120   ;;  %v1331_v2 = vmov 32.0   ;;  %v1235_v32 = vld [vmem:[%s1664_s4] ss:$0 sm:$0xff]  ;;  %vm549_vm5 = vcmask 64512   ;;  %v437_v43 = vlaneseq }
  0x19   : > { %1241 = vrcp.f32 %v1331_v2  ;;  %v1171_v14 = vld [vmem:[%s1681_s3 + $0x8] sm:$0xff]  ;;  %v1170_v15 = vld [vmem:[%s1681_s3] sm:$0xff]  ;;  %vm587_vm7 = vcmask 1043456  }
  0x1a   : > { %s1099_s21 = sshll.u32 %s433_s20, 3  ;;  %538 = vmatpush.bf16.msra.mxu0 %v1171_v14  ;;  %v1233_v25 = vld [vmem:[%s1682_s1] ss:$0 sm:$0xff]  ;;  %s1333_s20 = smov 96   ;;  %v1503_v44 = vshrl.u32 %v437_v43, 7  ;;  %v1505_v45 = vand.u32 127, %v437_v43 }
  0x1b   : > { %s435_s24 = scalar_lea.vmem %s1680_s0, %s1099_s21  ;;  %v1234_v28 = vld [vmem:[%s1683_s2] ss:$0 sm:$0xff]  ;;  %s1334_s21 = smov 80  }
  0x1c   : > { %v1466_v0 = vld [vmem:[%s435_s24] sm:$0xff]  ;;  %vm441_vm6 = vcmp.gt.s32.totalorder %v1505_v45, %v1503_v44  ;;  %s1337_s24 = smov 120   ;;  %s429_s0 = sand.u32 1, %s1321_s26  }
  0x1d   : > { %v476_v1 = vsel %vm475_vm0, %v1466_v0, 0.0  ;;  %v605_v55 = vld [vmem:[%s1665_s5] sm:$0xf]  ;;  %s1098_s1 = sshll.u32 %s429_s0, 3 }
  0x1e   : > { %477 = vadd.xlane.f32.xlu0 %v476_v1  ;;  %539 = vmatpush.bf16.msra.mxu0 %v1170_v15  ;;  %v689_v56 = vsel %vm587_vm7, %v605_v55, 0  ;;  %v1118_v55 = vld [vmem:[%s1665_s5 + $0x8] sm:$0xf] }
  0x1f   : > { %v1242_v3 = vpop.eup %1241  ;;  %698 = vmatpush.bf16.msra.mxu1 %v689_v56  ;;  %v768_v56 = vsel %vm587_vm7, %v1118_v55, 0 }
  0x20   : > { %v480_v4 = vmul.f32 32.0, %v1242_v3  ;;  %vm484_vm1 = vweird.f32 %v1242_v3 }
  0x22   : > { %v481_v5 = vsub.f32 1.0, %v480_v4 }
  0x24   : > { %v482_v6 = vmul.f32 %v1242_v3, %v481_v5 }
  0x26   : > { %v483_v7 = vadd.f32 %v1242_v3, %v482_v6 }
  0x28   : > { %v1470_v8 = vsel %vm484_vm1, %v1242_v3, %v483_v7 }
  0x91   : > { %v478_v9 = vpop.xlane.xlu0 %477 }
  0x92   : > { %v486_v10 = vmul.f32 %v1470_v8, %v478_v9 }
  0x94   : > { %v487_v11 = vsub.f32 %v1466_v0, %v486_v10 }
  0x96   : > { %v488_v12 = vmul.f32 %v487_v11, %v487_v11 }
  0x98   : > { %v489_v13 = vsel %vm475_vm0, %v488_v12, 0.0 }
  0x99   : > { %490 = vadd.xlane.f32.xlu0 %v489_v13 }
 0x10c   : > { %v491_v16 = vpop.xlane.xlu0 %490 }
 0x10d   : > { %v492_v17 = vmul.f32 %v491_v16, %v1470_v8 }
 0x10f   : > { %v493_v18 = vadd.f32 1e-05, %v492_v17 }
 0x111   : > { %1243 = vrsqrt.f32 %v493_v18  ;;  %vm500_vm3 = vweird.f32 %v493_v18 }
 0x117   : > { %v1244_v19 = vpop.eup %1243 }
 0x118   : > { %v495_v20 = vmul.f32 %v1244_v19, %v493_v18  ;;  %vm501_vm2 = vweird.f32 %v1244_v19 }
 0x119   : > { %vm502_vm4 = vmor %vm500_vm3, %vm501_vm2 }
 0x11a   : > { %v496_v21 = vmul.f32 %v1244_v19, %v495_v20 }
 0x11c   : > { %v497_v22 = vmul.f32 0.5, %v496_v21 }
 0x11e   : > { %v498_v23 = vsub.f32 1.5, %v497_v22 }
 0x120   : > { %v499_v24 = vmul.f32 %v1244_v19, %v498_v23 }
 0x122   : > { %v503_v26 = vsel %vm502_vm4, %v1244_v19, %v499_v24 }
 0x123   : > { %v504_v27 = vmul.f32 %v503_v26, %v487_v11 }
 0x125   : > { %v508_v29 = vmul.f32 %v1233_v25, %v504_v27 }
 0x127   : > { %v512_v30 = vadd.f32 %v1234_v28, %v508_v29 }
 0x129   : > { %v513_v31 = vpack.c.bf16 %v512_v30, %v512_v30 }
 0x12b   : > { %1108 = vmatmul.msk.bf16.vlgmr.msra.gmra.mxu0 %vm475_vm0, %v513_v31 }
 0x1a8   : > { %v541_v33 = vpop.f32.mrf.mxu0 }
 0x1a9   : > { %v542_v34 = vadd.f32 %v1235_v32, %v541_v33 }
 0x1ab   : > { %v1492_v35 = vpack.c.bf16 %v542_v34, %v542_v34 }
 0x1ad   : > { %608 = vrot.lane.b32.xlu0 %v1492_v35, %s1332_s16  ;;  %547 = vrot.lane.b32.xlu1 %v1492_v35, %s1333_s20 }
 0x1b0   : > { %v543_v36 = vpop.f32.mrf.mxu0 }
 0x1b5   : > { %706 = vrot.lane.b32.xlu0 %v1492_v35, %s1334_s21  ;;  %s1340_s21 = smov 40  }
 0x1bd   : > { %704 = vrot.lane.b32.xlu0 %v1492_v35, %s1335_s22  ;;  %s1341_s22 = smov 56  }
 0x21f   : > { %v609_v37 = vpop.permute.xlu0 %608  ;;  %v548_v38 = vpop.permute.xlu1 %547 }
 0x220   : > { %v554_v39 = vsel %vm549_vm5, %v548_v38, 0  ;;  %v614_v40 = vsel %vm549_vm5, %v609_v37, 0 }
 0x221   : > { %563 = vmatpush.bf16.xpose.msra.mxu3 %v554_v39 }
 0x227   : > { %v707_v41 = vpop.permute.xlu0 %706 }
 0x228   : > { %v712_v42 = vsel %vm549_vm5, %v707_v41, 0  ;;  %1109 = vmatmul.msk.bf16.vlgmr.msra.gmra.mxu3 %vm549_vm5, %v1492_v35 }
 0x229   : > { %623 = vmatpush.bf16.xpose.msrb.mxu3 %v614_v40 }
 0x22f   : > { %v705_v3 = vpop.permute.xlu0 %704 }
 0x231   : > { %721 = vmatpush.bf16.xpose.msra.mxu3 %v712_v42 }
 0x2ab   : > { %v565_v46 = vpop.f32.mrf.mxu3 }
 0x2ac   : > { %v569_v47 = vsel %vm441_vm6, -inf, %v565_v46 }
 0x2ad   : > { %v570_v48 = vsel %vm549_vm5, %v569_v47, -inf }
 0x2ae   : > { %571 = vmax.xlane.f32.xlu1 %v570_v48 }
 0x2b3   : > { %v567_v49 = vpop.f32.mrf.mxu3 }
 0x321   : > { %v572_v50 = vpop.xlane.xlu1 %571 }
 0x322   : > { %v573_v51 = vsub.f32 %v569_v47, %v572_v50 }
 0x324   : > { %v574_v52 = vmul.f32 1.442695, %v573_v51 }
 0x326   : > { %1245 = vpow2.f32 %v574_v52  ;;  %v1113_v52 = vld [vmem:[%s1665_s5 + $0x4] sm:$0xf] }
 0x32c   : > { %v1246_v53 = vpop.eup %1245 }
 0x32d   : > { %v576_v54 = vsel %vm549_vm5, %v1246_v53, 0.0 }
 0x32e   : > { %577 = vadd.xlane.f32.xlu2 %v576_v54 }
 0x346   : > { %582 = vrot.lane.b32.xlu2 %v1492_v35, %s1336_s23  ;;  %s1342_s23 = smov 48  }
 0x34e   : > { %606 = vrot.lane.b32.xlu2 %v1492_v35, %s1337_s24  ;;  %s1167_s24 = sshll.u32 %s1434_s29, 3  ;;  %s1020_s29 = scalar_lea.sflag [#allocation3], %s429_s0 }
 0x356   : > { %786 = vrot.lane.b32.xlu2 %v1492_v35, %s1338_s30 }
 0x35e   : > { %784 = vrot.lane.b32.xlu2 %v1492_v35, %s1339_s15 }
 0x3a1   : > { %v578_v57 = vpop.xlane.xlu2 %577 }
 0x3a2   : > { %1247 = vrcp.f32 %v578_v57 }
 0x3a8   : > { %v1248_v58 = vpop.eup %1247 }
 0x3a9   : > { %v583_v59 = vpop.permute.xlu2 %582  ;;  %v580_v60 = vmul.f32 %v1248_v58, %v1246_v53  ;;  %v670_v53 = vsel %vm587_vm7, %v1113_v52, 0  ;;  %v1174_v52 = vld [vmem:[%s1671_s11] sm:$0xff] }
 0x3aa   : > { %v589_v61 = vsel %vm587_vm7, %v583_v59, 0  ;;  %679 = vmatpush.bf16.msrb.mxu0 %v670_v53 }
 0x3ab   : > { %598 = vmatpush.bf16.msra.mxu2 %v589_v61  ;;  %v581_v62 = vpack.c.bf16 %v580_v60, %v580_v60  ;;  %v1122_v60 = vld [vmem:[%s1665_s5 + $0xc] sm:$0xf] }
 0x3ac   : > { %v848_v61 = vsel %vm587_vm7, %v1122_v60, 0 }
 0x3ae   : > { %1110 = vmatmul.msk.bf16.vlgmr.msra.gmra.mxu2 %vm549_vm5, %v581_v62  ;;  %777 = vmatpush.bf16.msra.mxu0 %v768_v56 }
 0x3b1   : > { %v607_v63 = vpop.permute.xlu2 %606 }
 0x3b2   : > { %1111 = vmatmul.msk.bf16.vlgmr.msrb.gmra.mxu3 %vm549_vm5, %v607_v63 }
 0x3b9   : > { %v787_v1 = vpop.permute.xlu2 %786 }
 0x3ba   : > { %v792_v2 = vsel %vm549_vm5, %v787_v1, 0 }
 0x3bb   : > { %801 = vmatpush.bf16.xpose.msrb.mxu1 %v792_v2 }
 0x3c1   : > { %v785_v12 = vpop.permute.xlu2 %784 }
 0x3c2   : > { %1116 = vmatmul.msk.bf16.vlgmr.msra.gmra.mxu3 %vm549_vm5, %v705_v3 }
 0x431   : > { %v600_v4 = vpop.f32.mrf.mxu2 }
 0x432   : > { %v604_v5 = vpack.c.bf16 %v600_v4, %v600_v4 }
 0x434   : > { %1115 = vmatmul.msk.bf16.vlgmr.msra.gmra.mxu1 %vm549_vm5, %v604_v5 }
 0x435   : > { %v625_v6 = vpop.f32.mrf.mxu3 }
 0x436   : > { %v629_v7 = vsel %vm441_vm6, -inf, %v625_v6 }
 0x437   : > { %v630_v9 = vsel %vm549_vm5, %v629_v7, -inf }
 0x438   : > { %631 = vmax.xlane.f32.xlu1 %v630_v9 }
 0x439   : > { %v602_v10 = vpop.f32.mrf.mxu2 }
 0x43d   : > { %v627_v11 = vpop.f32.mrf.mxu3 }
 0x444   : > { %1120 = vmatmul.msk.bf16.vlgmr.msrb.gmra.mxu1 %vm549_vm5, %v785_v12 }
 0x445   : > { %v723_v13 = vpop.f32.mrf.mxu3 }
 0x446   : > { %v727_v14 = vsel %vm441_vm6, -inf, %v723_v13 }
 0x447   : > { %v728_v15 = vsel %vm549_vm5, %v727_v14, -inf }
 0x448   : > { %729 = vmax.xlane.f32.xlu2 %v728_v15  ;;  %v1236_v15 = vld [vmem:[%s1666_s6] ss:$0 sm:$0xff] }
 0x44d   : > { %v725_v16 = vpop.f32.mrf.mxu3 }
 0x460   : > { %820 = vrot.lane.b32.xlu2 %v1492_v35, %s1340_s21  ;;  %s1030_s21 = scalar_lea.hbm %s1673_s13, %s1167_s24 }
 0x461   : > { %s1034_s2 = sshll.u32 %s1030_s21, 4  ;;  %s1035_s2 = int_to_ptr.hbm [resolvable:$true] %s1034_s2 }
 0x462   : > { %s1281_s3 = sshra.s32 %s1035_s2, 4  ;;  %s1282_s3 = int_to_ptr.hbm [resolvable:$true] %s1281_s3 }
 0x463   : > { %s1283_s30 = scalar_lea.hbm %s1282_s3, 8  ;;  %p1288_p0 = scmp.lt.s32.totalorder %s1282_s3, %s1673_s13 }
 0x464   : > { %p1284_p11 = scmp.ne.s32.totalorder %s1282_s3, %s1283_s30 }
 0x466   : > { %p1285_p12 = pnand %p1284_p11, %p1451_p5 }
 0x468   : > { %p1286_p13 = pneg %p1285_p12 }
 0x4ab   : > { %v632_v17 = vpop.xlane.xlu1 %631 }
 0x4ac   : > { %v633_v18 = vsub.f32 %v629_v7, %v632_v17 }
 0x4ae   : > { %v634_v19 = vmul.f32 1.442695, %v633_v18 }
 0x4b0   : > { %1249 = vpow2.f32 %v634_v19 }
 0x4b1   : > { %v1538_v20 = vpop.f32.mrf.mxu1 }
 0x4b6   : > { %v1250_v21 = vpop.eup %1249 }
 0x4b7   : > { %v636_v22 = vsel %vm549_vm5, %v1250_v21, 0.0 }
 0x4b8   : > { %637 = vadd.xlane.f32.xlu1 %v636_v22 }
 0x4b9   : > { %v702_v23 = vpop.f32.mrf.mxu1 }
 0x4bb   : > { %v730_v24 = vpop.xlane.xlu2 %729 }
 0x4bc   : > { %v731_v25 = vsub.f32 %v727_v14, %v730_v24 }
 0x4be   : > { %v732_v26 = vmul.f32 1.442695, %v731_v25 }
 0x4c0   : > { %1251 = vpow2.f32 %v732_v26 }
 0x4c1   : > { %v803_v27 = vpop.f32.mrf.mxu1 }
 0x4c2   : > { %v807_v28 = vsel %vm441_vm6, -inf, %v803_v27  ;;  %v1173_v27 = vld [vmem:[%s1669_s9 + $0x8] sm:$0xff] }
 0x4c3   : > { %v821_v29 = vpop.permute.xlu2 %820  ;;  %v808_v30 = vsel %vm549_vm5, %v807_v28, -inf }
 0x4c4   : > { %v826_v31 = vsel %vm587_vm7, %v821_v29, 0  ;;  %809 = vmax.xlane.f32.xlu0 %v808_v30 }
 0x4c5   : > { %835 = vmatpush.bf16.msrb.mxu3 %v826_v31 }
 0x4c6   : > { %v1252_v32 = vpop.eup %1251 }
 0x4c7   : > { %v734_v34 = vsel %vm549_vm5, %v1252_v32, 0.0 }
 0x4c9   : > { %v805_v33 = vpop.f32.mrf.mxu1 }
 0x4cc   : > { %735 = vadd.xlane.f32.xlu0 %v734_v34 }
 0x4d1   : > { %642 = vrot.lane.b32.xlu1 %v1492_v35, %s1341_s22  ;;  %s431_s22 = scalar_lea.vmem [#allocation2], %s1098_s1  ;;  %s1287_s1 = scalar_lea.hbm %s1673_s13, 16 }
 0x4d2   : > { %p1289_p1 = scmp.lt.s32.totalorder %s1287_s1, %s1283_s30 }
 0x4d4   : > { %p1290_p2 = por %p1289_p1, %p1288_p0 }
 0x4d6   : > { %p1291_p3 = pnand %p1290_p2, %p1286_p13 }
 0x4e0   : > { %740 = vrot.lane.b32.xlu0 %v1492_v35, %s1342_s23  ;;  %s1032_s23 = sshll.u32 %s431_s22, 4  ;;  %s1033_s23 = int_to_ptr.vmem [resolvable:$true] %s1032_s23 }
 0x52b   : > { %v638_v36 = vpop.xlane.xlu1 %637 }
 0x52c   : > { %1253 = vrcp.f32 %v638_v36 }
 0x532   : > { %v1254_v40 = vpop.eup %1253 }
 0x533   : > { %v640_v42 = vmul.f32 %v1254_v40, %v1250_v21 }
 0x535   : > { %v641_v47 = vpack.c.bf16 %v640_v42, %v640_v42 }
 0x537   : > { %v810_v37 = vpop.xlane.xlu0 %809 }
 0x538   : > { %v811_v38 = vsub.f32 %v807_v28, %v810_v37 }
 0x53a   : > { %v812_v39 = vmul.f32 1.442695, %v811_v38  ;;  %v1237_v38 = vld [vmem:[%s1667_s7] ss:$0 sm:$0xff] }
 0x53c   : > { %1255 = vpow2.f32 %v812_v39 }
 0x53f   : > { %v736_v46 = vpop.xlane.xlu0 %735 }
 0x540   : > { %1257 = vrcp.f32 %v736_v46  ;;  %v1179_v46 = vld [vmem:[%s1671_s11 + $0x28] sm:$0xff] }
 0x542   : > { %v1256_v41 = vpop.eup %1255 }
 0x543   : > { %v643_v43 = vpop.permute.xlu1 %642  ;;  %v814_v44 = vsel %vm549_vm5, %v1256_v41, 0.0 }
 0x544   : > { %815 = vadd.xlane.f32.xlu1 %v814_v44  ;;  %v648_v45 = vsel %vm587_vm7, %v643_v43, 0  ;;  %v1181_v44 = vld [vmem:[%s1671_s11 + $0x38] sm:$0xff] }
 0x545   : > { %657 = vmatpush.bf16.msrb.mxu2 %v648_v45  ;;  %1004 = vmatpush.bf16.msra.mxu1 %v1181_v44  ;;  %v1180_v45 = vld [vmem:[%s1671_s11 + $0x30] sm:$0xff] }
 0x546   : > { %v1258_v35 = vpop.eup %1257 }
 0x547   : > { %v738_v48 = vmul.f32 %v1258_v35, %v1252_v32  ;;  %v1177_v35 = vld [vmem:[%s1671_s11 + $0x18] sm:$0xff] }
 0x548   : > { %1112 = vmatmul.msk.bf16.vlgmr.msrb.gmra.mxu2 %vm549_vm5, %v641_v47  ;;  %v1178_v47 = vld [vmem:[%s1671_s11 + $0x20] sm:$0xff] }
 0x549   : > { %v739_v51 = vpack.c.bf16 %v738_v48, %v738_v48  ;;  %1005 = vmatpush.bf16.msra.mxu1 %v1180_v45  ;;  %v1176_v48 = vld [vmem:[%s1671_s11 + $0x10] sm:$0xff] }
 0x54d   : > { %1006 = vmatpush.bf16.msra.mxu1 %v1179_v46 }
 0x551   : > { %1007 = vmatpush.bf16.msra.mxu1 %v1178_v47 }
 0x552   : > { %v741_v49 = vpop.permute.xlu0 %740 }
 0x553   : > { %v746_v50 = vsel %vm587_vm7, %v741_v49, 0  ;;  %v1175_v49 = vld [vmem:[%s1671_s11 + $0x8] sm:$0xff] }
 0x554   : > { %755 = vmatpush.bf16.msra.mxu2 %v746_v50  ;;  %v1239_v50 = vld [vmem:[%s1670_s10] ss:$0 sm:$0xff] }
 0x555   : > { %1008 = vmatpush.bf16.msra.mxu1 %v1177_v35 }
 0x558   : > { %1117 = vmatmul.msk.bf16.vlgmr.msra.gmra.mxu2 %vm549_vm5, %v739_v51 }
 0x559   : > { %857 = vmatpush.bf16.msrb.mxu2 %v848_v61  ;;  %1009 = vmatpush.bf16.msra.mxu1 %v1176_v48 }
 0x55d   : > { %1010 = vmatpush.bf16.msra.mxu1 %v1175_v49 }
 0x561   : > { %1011 = vmatpush.bf16.msra.mxu1 %v1174_v52 }
 0x5b7   : > { %v816_v54 = vpop.xlane.xlu1 %815 }
 0x5b8   : > { %1259 = vrcp.f32 %v816_v54 }
 0x5be   : > { %v1260_v57 = vpop.eup %1259 }
 0x5bf   : > { %v818_v58 = vmul.f32 %v1260_v57, %v1256_v41 }
 0x5c1   : > { %v819_v59 = vpack.c.bf16 %v818_v58, %v818_v58 }
 0x5c3   : > { %1121 = vmatmul.msk.bf16.vlgmr.msrb.gmra.mxu3 %vm549_vm5, %v819_v59 }
 0x5cb   : > { %v659_v62 = vpop.f32.mrf.mxu2 }
 0x5cc   : > { %v663_v63 = vpack.c.bf16 %v659_v62, %v659_v62 }
 0x5ce   : > { %1114 = vmatmul.msk.bf16.vlgmr.msrb.gmra.mxu0 %vm549_vm5, %v663_v63 }
 0x5cf   : > { %924 = vmatpush.bf16.msrb.mxu0 %v1173_v27 }
 0x5d3   : > { %v661_v1 = vpop.f32.mrf.mxu2 }
 0x5db   : > { %v757_v2 = vpop.f32.mrf.mxu2 }
 0x5dc   : > { %v761_v3 = vpack.c.bf16 %v757_v2, %v757_v2 }
 0x5de   : > { %1119 = vmatmul.msk.bf16.vlgmr.msra.gmra.mxu0 %vm549_vm5, %v761_v3 }
 0x5e3   : > { %v759_v4 = vpop.f32.mrf.mxu2 }
 0x646   : > { %v837_v5 = vpop.f32.mrf.mxu3 }
 0x647   : > { %v841_v6 = vpack.c.bf16 %v837_v5, %v837_v5 }
 0x649   : > { %1123 = vmatmul.msk.bf16.vlgmr.msrb.gmra.mxu2 %vm549_vm5, %v841_v6 }
 0x64b   : > { %v681_v7 = vpop.f32.mrf.mxu0 }
 0x64c   : > { %v701_v11 = vadd.f32 %v1538_v20, %v681_v7 }
 0x64e   : > { %v839_v9 = vpop.f32.mrf.mxu3 }
 0x64f   : > { %v1240_v9 = vld [vmem:[%s1672_s12] ss:$0 sm:$0xff] }
 0x653   : > { %v683_v10 = vpop.f32.mrf.mxu0 }
 0x65b   : > { %v779_v12 = vpop.f32.mrf.mxu0 }
 0x65c   : > { %v783_v13 = vadd.f32 %v779_v12, %v701_v11 }
 0x663   : > { %v781_v14 = vpop.f32.mrf.mxu0 }
 0x6cc   : > { %v859_v16 = vpop.f32.mrf.mxu2 }
 0x6cd   : > { %v863_v17 = vadd.f32 %v859_v16, %v783_v13 }
 0x6cf   : > { %v867_v18 = vadd.f32 %v1236_v15, %v863_v17 }
 0x6d1   : > { %v1575_v19 = vadd.f32 %v867_v18, %v1466_v0  ;;  %v1172_v0 = vld [vmem:[%s1669_s9] sm:$0xff] }
 0x6d2   : > { %925 = vmatpush.bf16.msrb.mxu0 %v1172_v0 }
 0x6d3   : > { %v869_v21 = vsel %vm475_vm0, %v1575_v19, 0.0 }
 0x6d4   : > { %870 = vadd.xlane.f32.xlu2 %v869_v21  ;;  %v861_v22 = vpop.f32.mrf.mxu2 }
 0x747   : > { %v871_v23 = vpop.xlane.xlu2 %870 }
 0x748   : > { %v872_v20 = vmul.f32 %v871_v23, %v1470_v8 }
 0x74a   : > { %v873_v24 = vsub.f32 %v1575_v19, %v872_v20 }
 0x74c   : > { %v874_v25 = vmul.f32 %v873_v24, %v873_v24 }
 0x74e   : > { %v875_v26 = vsel %vm475_vm0, %v874_v25, 0.0 }
 0x74f   : > { %876 = vadd.xlane.f32.xlu0 %v875_v26 }
 0x7c2   : > { %v877_v28 = vpop.xlane.xlu0 %876 }
 0x7c3   : > { %v878_v29 = vmul.f32 %v877_v28, %v1470_v8  ;;  %v1238_v8 = vld [vmem:[%s1668_s8] ss:$0 sm:$0xff] }
 0x7c5   : > { %v879_v30 = vadd.f32 1e-05, %v878_v29 }
 0x7c7   : > { %1261 = vrsqrt.f32 %v879_v30  ;;  %vm886_vm9 = vweird.f32 %v879_v30 }
 0x7cd   : > { %v1262_v31 = vpop.eup %1261 }
 0x7ce   : > { %v881_v32 = vmul.f32 %v1262_v31, %v879_v30  ;;  %vm887_vm8 = vweird.f32 %v1262_v31 }
 0x7cf   : > { %vm888_vm10 = vmor %vm886_vm9, %vm887_vm8 }
 0x7d0   : > { %v882_v33 = vmul.f32 %v1262_v31, %v881_v32 }
 0x7d2   : > { %v883_v34 = vmul.f32 0.5, %v882_v33 }
 0x7d4   : > { %v884_v36 = vsub.f32 1.5, %v883_v34 }
 0x7d6   : > { %v885_v37 = vmul.f32 %v1262_v31, %v884_v36 }
 0x7d8   : > { %v889_v39 = vsel %vm888_vm10, %v1262_v31, %v885_v37 }
 0x7d9   : > { %v890_v40 = vmul.f32 %v889_v39, %v873_v24 }
 0x7db   : > { %v894_v41 = vmul.f32 %v1237_v38, %v890_v40 }
 0x7dd   : > { %v898_v42 = vadd.f32 %v1238_v8, %v894_v41 }
 0x7df   : > { %v899_v43 = vpack.c.bf16 %v898_v42, %v898_v42 }
 0x7e1   : > { %1132 = vmatmul.msk.bf16.vlgmr.msrb.gmra.mxu0 %vm475_vm0, %v899_v43 }
 0x85e   : > { %v927_v51 = vpop.f32.mrf.mxu0 }
 0x85f   : > { %v928_v53 = vadd.f32 %v1239_v50, %v927_v51 }
 0x861   : > { %v1133_v54 = vmul.f32 -1.702, %v928_v53 }
 0x863   : > { %v933_v55 = vmul.f32 1.442695, %v1133_v54 }
 0x865   : > { %1263 = vpow2.f32 %v933_v55 }
 0x866   : > { %v929_v56 = vpop.f32.mrf.mxu0 }
 0x86b   : > { %v1264_v57 = vpop.eup %1263 }
 0x86c   : > { %v935_v58 = vadd.f32 1.0, %v1264_v57 }
 0x86e   : > { %1265 = vrcp.f32 %v935_v58  ;;  %v947_v62 = vand.u32 2147483648, %v935_v58  ;;  %v945_v1 = vand.u32 2147483647, %v935_v58  ;;  %vm941_vm12 = vweird.f32 %v935_v58 }
 0x870   : > { %v948_v3 = vor.u32 1.1754944e-38, %v947_v62  ;;  %vm946_vm14 = vcmp.eq.f32.partialorder %v945_v1, 8.507059e+37 }
 0x874   : > { %v1266_v59 = vpop.eup %1265 }
 0x875   : > { %v937_v60 = vmul.f32 %v1266_v59, %v935_v58  ;;  %vm942_vm11 = vweird.f32 %v1266_v59 }
 0x876   : > { %vm943_vm13 = vmor %vm941_vm12, %vm942_vm11 }
 0x877   : > { %v938_v61 = vsub.f32 1.0, %v937_v60 }
 0x879   : > { %v939_v63 = vmul.f32 %v1266_v59, %v938_v61 }
 0x87b   : > { %v940_v2 = vadd.f32 %v1266_v59, %v939_v63 }
 0x87d   : > { %v944_v4 = vsel %vm943_vm13, %v1266_v59, %v940_v2 }
 0x87e   : > { %v949_v5 = vsel %vm946_vm14, %v948_v3, %v944_v4 }
 0x87f   : > { %v951_v6 = vmul.f32 %v949_v5, %v928_v53 }
 0x881   : > { %v952_v7 = vpack.c.bf16 %v951_v6, %v951_v6 }
 0x883   : > { %1012 = vmatmul.bf16.vlgmr.msra.gmra.mxu1 %v952_v7 }
 0x900   : > { %v1013_v10 = vpop.f32.mrf.mxu1 }
 0x901   : > { %v1014_v11 = vadd.f32 %v1240_v9, %v1013_v10 }
 0x903   : > { %v1017_v12 = vadd.f32 %v1014_v11, %v1575_v19 }
 0x905   : > { %1018 = vst.msk [vmem:[%s431_s22] sm:$0xff] %vm475_vm0, %v1017_v12 }
 0x906   : > { %1294 = shalt.err (!%p1291_p3)
}
 0x907   : > { %1182 = dma.vmem_to_hbm [thread:$0]  (%p1451_p5), %s1033_s23, 128, %s1035_s2, %s1020_s29  }
 0x908   : > { %v1015_v13 = vpop.f32.mrf.mxu1 }
 0x909 PF: > { %p1188_p4 = scmp.ge.s32.totalorder %s1329_s28, 2  ;;  %s1046_s0 = sand.u32 1, %s1317_s25  }
 0x90a   : > { %s1047_s21 = scalar_lea.sflag [#allocation3], %s1046_s0 }
 0x90b   : > { %p1185_p7 = pnand %p1188_p4, %p1455_p6 }
 0x90d   : > { %p1186_p8 = pneg %p1185_p7 }
 0x90f   : > { %1312 = dma.done.wait (%p1186_p8), %s1047_s21, 128  }
 0x910   : > { %1314 = vsyncadd (%p1186_p8), %s1047_s21, 4294967168  ;;  %p23_p9 = scmp.ge.s32.totalorder %s1438_s14, 4   ;;  %s1684_s25 = smov %s1321_s26 }
 0x911   : > { %s1685_s26 = smov %s1325_s27  ;;  %s1686_s27 = smov %s1449_s17 }
 0x912   : > { %s1687_s28 = smov %s1438_s14  ;;  %25 = sbr.rel (!%p23_p9) target bundleno = 8 (0x8), region = 110 }
 0x917   :  { %1053 = vsyncpa [#allocation3], 1 }
 0x918   :  { %1055 = vsyncpa [#allocation3 + $0x1], 1 }

</bundles_post_ra>
